<compile_context>
chip_gen: v7x
topology: tpu7x:2x2x1
jax: 0.10.0
libtpu: 0.0.40
codegen_flags: <defaults>
</compile_context>

<pallas_src>
import jax
import jax.numpy as jnp
from jax.experimental import pallas as pl
from jax.experimental.pallas import tpu as pltpu


def _round_up(x, m):
    return ((x + m - 1) // m) * m


def identity_kernel(x_ref, wconv_ref, bconv_ref, wfc_ref, bfc_ref, out_ref,
                    acc_ref):
    # x_ref:     (TB, TS, E)    input tile, native layout / dtype
    # wconv_ref: (1, E)         Conv2d(1,1,(1,E)) weight
    # bconv_ref: (1, 1)         conv bias scalar, in SMEM
    # wfc_ref:   (TS, OUT_PAD)  fc1 weight rows for this seq tile (streamed)
    # bfc_ref:   (1, OUT_PAD)   fc1 bias (lane-padded)
    # out_ref:   (TB, OUT_PAD)  lane-dense output tile
    # acc_ref:   (TB, OUT_PAD)  f32 accumulator across the seq grid axis
    s_blk = pl.program_id(1)
    n_s = pl.num_programs(1)

    @pl.when(s_blk == 0)
    def _init():
        acc_ref[...] = jnp.zeros_like(acc_ref)

    x = x_ref[...].astype(jnp.float32)                       # (TB, TS, E)
    wc = wconv_ref[...].astype(jnp.float32)                  # (1, E)
    bc = bconv_ref[0, 0]                                     # scalar from SMEM

    # Conv2d(1, 1, (1, E)) spans the full width -> per-(b, s) dot over E.
    # Done for the whole tile at once: VPU broadcast-multiply + lane reduce,
    # then bias + ReLU.  No per-column matmuls, no staging scratch.
    h = jnp.maximum(jnp.sum(x * wc[jnp.newaxis], axis=-1) + bc, 0.0)  # (TB, TS)

    # Partial fc1 contraction over this seq tile on the MXU.
    acc_ref[...] += jnp.dot(h, wfc_ref[...], preferred_element_type=jnp.float32)

    @pl.when(s_blk == n_s - 1)
    def _finalize():
        o = jnp.maximum(acc_ref[...] + bfc_ref[...], 0.0)
        out_ref[...] = o.astype(out_ref.dtype)


def identity_forward(x, wconv, bconv, wfc, bfc, *,
                     max_batch_tile=256, max_seq_tile=2048,
                     vmem_budget_bytes=40 * 1024 * 1024,
                     vmem_limit_bytes=48 * 1024 * 1024):
    """Forward pass of the Identity head.

    x:     (B, S, E)    Performer output, channel-last (E = 200 = conv width)
    wconv: (1, E)       Conv2d(1,1,(1,E)) weight, squeezed
    bconv: (1, 1)       Conv2d bias
    wfc:   (S, out_dim) Linear(SEQ_LEN, out_dim) weight, pre-transposed
    bfc:   (1, out_dim) Linear bias
    """
    B, S, E = x.shape
    out_dim = wfc.shape[1]
    dtype = x.dtype
    itemsize = jnp.dtype(dtype).itemsize

    out_pad = _round_up(out_dim, 128)      # lane-dense output
    e_lanes = _round_up(E, 128)            # lane-padded x tile width in VMEM

    # ---- tile sizing (VMEM accounting includes padding + double buffers) ----
    b_pad = _round_up(B, 8)
    tb = min(b_pad, max_batch_tile)
    if b_pad // tb < 2 and tb >= 16:       # keep >= 2 batch blocks for 2-TC chips
        tb //= 2

    def vmem_bytes(tb_, ts_):
        x_b = 2 * tb_ * ts_ * e_lanes * itemsize   # double-buffered x tile
        wfc_b = 2 * ts_ * out_pad * 4              # streamed fc weight block
        acc_b = tb_ * out_pad * 4                  # resident f32 accumulator
        out_b = 2 * tb_ * out_pad * itemsize       # output tile buffers
        misc = 2 * (e_lanes * 4 + out_pad * 4)     # conv weight / fc bias
        return x_b + wfc_b + acc_b + out_b + misc

    if S <= 128:
        ts = _round_up(S, 8)
    else:
        ts = min(_round_up(S, 128), _round_up(max_seq_tile, 128))
        while ts > 128 and vmem_bytes(tb, ts) > vmem_budget_bytes:
            ts -= 128
    while tb > 8 and vmem_bytes(tb, ts) > vmem_budget_bytes:
        tb //= 2

    b_pad = _round_up(b_pad, tb)
    s_pad = _round_up(S, ts)

    # ---- wrapper-side padding only: no transpose, no dtype upcast of x ----
    if (b_pad, s_pad) != (B, S):
        x = jnp.pad(x, ((0, b_pad - B), (0, s_pad - S), (0, 0)))
    wconv_r = wconv.astype(jnp.float32).reshape(1, E)
    bconv_r = bconv.astype(jnp.float32).reshape(1, 1)
    # Zero-padded wfc rows neutralize the padded seq positions exactly
    # (ReLU(bias) there multiplies a zero row), so padding S is exact.
    wfc_p = jnp.pad(wfc.astype(jnp.float32),
                    ((0, s_pad - S), (0, out_pad - out_dim)))
    bfc_p = jnp.pad(bfc.astype(jnp.float32).reshape(1, out_dim),
                    ((0, 0), (0, out_pad - out_dim)))

    grid = (b_pad // tb, s_pad // ts)

    out = pl.pallas_call(
        identity_kernel,
        out_shape=jax.ShapeDtypeStruct((b_pad, out_pad), dtype),
        grid_spec=pltpu.PrefetchScalarGridSpec(
            num_scalar_prefetch=0,
            grid=grid,
            in_specs=[
                pl.BlockSpec((tb, ts, E), lambda i, s: (i, s, 0)),      # x in place
                pl.BlockSpec((1, E), lambda i, s: (0, 0)),              # conv weight
                pl.BlockSpec(memory_space=pltpu.MemorySpace.SMEM),      # conv bias
                pl.BlockSpec((ts, out_pad), lambda i, s: (s, 0)),       # streamed fc rows
                pl.BlockSpec((1, out_pad), lambda i, s: (0, 0)),        # fc bias
            ],
            out_specs=pl.BlockSpec((tb, out_pad), lambda i, s: (i, 0)),
            scratch_shapes=[
                pltpu.VMEM((tb, out_pad), jnp.float32),   # fc accumulator
            ],
        ),
        compiler_params=pltpu.CompilerParams(
            dimension_semantics=("parallel", "arbitrary"),
            vmem_limit_bytes=vmem_limit_bytes),
    )(x, wconv_r, bconv_r, wfc_p, bfc_p)

    return out[:B, :out_dim]


def identity_reference(x, wconv, bconv, wfc, bfc):
    h = jnp.einsum("bse,oe->bs", x, wconv) + bconv[0, 0]
    h = jnp.maximum(h, 0.0)
    o = h @ wfc + bfc
    return jnp.maximum(o, 0.0)


if __name__ == "__main__":
    # Small deterministic shapes consistent with the module:
    # SEQ_LEN (= gene_num + 1) = 8, conv width / embed = 200 (hard-wired by
    # Conv2d(1,1,(1,200))), out_dim = 10, batch = 2.
    B, SEQ_LEN, EMB, OUT_DIM = 2, 8, 200, 10

    key = jax.random.PRNGKey(0)
    kx, kcw, kcb, kfw, kfb = jax.random.split(key, 5)

    x = jax.random.normal(kx, (B, SEQ_LEN, EMB), dtype=jnp.float32)
    wconv = jax.random.normal(kcw, (1, EMB), dtype=jnp.float32) * 0.05    # Conv2d weight (1,1,1,200)
    bconv = jax.random.normal(kcb, (1, 1), dtype=jnp.float32) * 0.05      # Conv2d bias (1,)
    wfc = jax.random.normal(kfw, (SEQ_LEN, OUT_DIM), dtype=jnp.float32) * 0.1  # Linear weight^T
    bfc = jax.random.normal(kfb, (1, OUT_DIM), dtype=jnp.float32) * 0.1         # Linear bias

    out = identity_forward(x, wconv, bconv, wfc, bfc)
    out = jax.block_until_ready(out)

    ref = identity_reference(x, wconv, bconv, wfc, bfc)
    assert out.shape == (B, OUT_DIM), out.shape
    assert jnp.allclose(out, ref, rtol=1e-4, atol=1e-4), "mismatch vs reference"

    print("KERNEL_OK")
</pallas_src>

<mosaic_0001>
module attributes {stable_mosaic.version = 11 : i64} {
  func.func @identity_kernel(%arg0: i32, %arg1: i32, %arg2: memref<8x8x200xf32, #tpu.memory_space<vmem>>, %arg3: memref<1x200xf32, #tpu.memory_space<vmem>>, %arg4: memref<1x1xf32, #tpu.memory_space<smem>>, %arg5: memref<8x128xf32, #tpu.memory_space<vmem>>, %arg6: memref<1x128xf32, #tpu.memory_space<vmem>>, %arg7: memref<8x128xf32, #tpu.memory_space<vmem>>, %arg8: memref<8x128xf32, #tpu.memory_space<vmem>>) attributes {dimension_semantics = [#tpu.dimension_semantics<parallel>, #tpu.dimension_semantics<arbitrary>], iteration_bounds = array<i64: 1, 1>, scalar_prefetch = 0 : i64, scratch_operands = 1 : i64, tpu.core_type = #tpu.core_type<tc>, window_params = [{transform_indices = @transform_0, window_bounds = array<i64: 8, 8, 200>}, {pipeline_mode = #tpu.pipeline_mode<synchronous>, transform_indices = @transform_1, window_bounds = array<i64: 1, 200>}, {transform_indices = @transform_2, window_bounds = array<i64: 1, 1>}, {transform_indices = @transform_3, window_bounds = array<i64: 8, 128>}, {pipeline_mode = #tpu.pipeline_mode<synchronous>, transform_indices = @transform_4, window_bounds = array<i64: 1, 128>}, {transform_indices = @transform_5, window_bounds = array<i64: 8, 128>}]} {
    %c0_i32 = arith.constant 0 : i32
    %0 = arith.cmpi eq, %arg1, %c0_i32 : i32
    %1 = arith.extui %0 : i1 to i32
    %c0_i32_0 = arith.constant 0 : i32
    %2 = arith.cmpi ne, %1, %c0_i32_0 : i32
    scf.if %2 {
      %cst_17 = arith.constant 0.000000e+00 : f32
      %22 = vector.broadcast %cst_17 : f32 to vector<8x128xf32>
      %c0_18 = arith.constant 0 : index
      %c0_19 = arith.constant 0 : index
      %23 = vector.load %arg8[%c0_18, %c0_19] : memref<8x128xf32, #tpu.memory_space<vmem>>, vector<8x128xf32>
      tpu.vector_store %arg8[%c0_18, %c0_19], %22 {strides = array<i32>} : memref<8x128xf32, #tpu.memory_space<vmem>>, vector<8x128xf32>,
    } else {
    }
    %c0 = arith.constant 0 : index
    %c0_1 = arith.constant 0 : index
    %c0_2 = arith.constant 0 : index
    %3 = vector.load %arg2[%c0, %c0_1, %c0_2] : memref<8x8x200xf32, #tpu.memory_space<vmem>>, vector<8x8x200xf32>
    %c0_3 = arith.constant 0 : index
    %c0_4 = arith.constant 0 : index
    %4 = vector.load %arg3[%c0_3, %c0_4] : memref<1x200xf32, #tpu.memory_space<vmem>>, vector<1x200xf32>
    %c0_5 = arith.constant 0 : index
    %c0_6 = arith.constant 0 : index
    %5 = memref.load %arg4[%c0_5, %c0_6] : memref<1x1xf32, #tpu.memory_space<smem>>
    %6 = vector.shape_cast %4 : vector<1x200xf32> to vector<1x1x200xf32>
    %7 = vector.broadcast %6 : vector<1x1x200xf32> to vector<8x8x200xf32>
    %8 = arith.mulf %3, %7 : vector<8x8x200xf32>
    %cst = arith.constant dense<0.000000e+00> : vector<8x8xf32>
    %9 = vector.multi_reduction <add>, %8, %cst [2] : vector<8x8x200xf32> to vector<8x8xf32>
    %10 = vector.broadcast %5 : f32 to vector<8x8xf32>
    %11 = arith.addf %9, %10 : vector<8x8xf32>
    %cst_7 = arith.constant 0.000000e+00 : f32
    %12 = vector.broadcast %cst_7 : f32 to vector<8x8xf32>
    %13 = arith.maximumf %11, %12 : vector<8x8xf32>
    %c0_8 = arith.constant 0 : index
    %c0_9 = arith.constant 0 : index
    %14 = vector.load %arg8[%c0_8, %c0_9] : memref<8x128xf32, #tpu.memory_space<vmem>>, vector<8x128xf32>
    %c0_10 = arith.constant 0 : index
    %c0_11 = arith.constant 0 : index
    %15 = vector.load %arg5[%c0_10, %c0_11] : memref<8x128xf32, #tpu.memory_space<vmem>>, vector<8x128xf32>
    %cst_12 = arith.constant dense<0.000000e+00> : vector<8x128xf32>
    %16 = tpu.matmul %13, %15, %cst_12 {dimension_numbers = #tpu.dot_dimension_numbers<[1], [0], [0], [1], [0, 0, 1, 1], [], []>} : vector<8x8xf32>, vector<8x128xf32>, vector<8x128xf32> -> vector<8x128xf32>
    %17 = arith.addf %14, %16 : vector<8x128xf32>
    %c0_13 = arith.constant 0 : index
    %c0_14 = arith.constant 0 : index
    %18 = vector.load %arg8[%c0_13, %c0_14] : memref<8x128xf32, #tpu.memory_space<vmem>>, vector<8x128xf32>
    tpu.vector_store %arg8[%c0_13, %c0_14], %17 {strides = array<i32>} : memref<8x128xf32, #tpu.memory_space<vmem>>, vector<8x128xf32>,
    %c0_i32_15 = arith.constant 0 : i32
    %19 = arith.cmpi eq, %arg1, %c0_i32_15 : i32
    %20 = arith.extui %19 : i1 to i32
    %c0_i32_16 = arith.constant 0 : i32
    %21 = arith.cmpi ne, %20, %c0_i32_16 : i32
    scf.if %21 {
      %c0_17 = arith.constant 0 : index
      %c0_18 = arith.constant 0 : index
      %22 = vector.load %arg8[%c0_17, %c0_18] : memref<8x128xf32, #tpu.memory_space<vmem>>, vector<8x128xf32>
      %c0_19 = arith.constant 0 : index
      %c0_20 = arith.constant 0 : index
      %23 = vector.load %arg6[%c0_19, %c0_20] : memref<1x128xf32, #tpu.memory_space<vmem>>, vector<1x128xf32>
      %24 = vector.broadcast %23 : vector<1x128xf32> to vector<8x128xf32>
      %25 = arith.addf %22, %24 : vector<8x128xf32>
      %cst_21 = arith.constant 0.000000e+00 : f32
      %26 = vector.broadcast %cst_21 : f32 to vector<8x128xf32>
      %27 = arith.maximumf %25, %26 : vector<8x128xf32>
      %c0_22 = arith.constant 0 : index
      %c0_23 = arith.constant 0 : index
      %28 = vector.load %arg7[%c0_22, %c0_23] : memref<8x128xf32, #tpu.memory_space<vmem>>, vector<8x128xf32>
      tpu.vector_store %arg7[%c0_22, %c0_23], %27 {strides = array<i32>} : memref<8x128xf32, #tpu.memory_space<vmem>>, vector<8x128xf32>,
    } else {
    }
    return
  }
  func.func @transform_0(%arg0: i32, %arg1: i32) -> (i32, i32, i32) {
    %c0_i32 = arith.constant 0 : i32
    %c0_i32_0 = arith.constant 0 : i32
    return %arg0, %arg1, %c0_i32 : i32, i32, i32
  }
  func.func @transform_1(%arg0: i32, %arg1: i32) -> (i32, i32) {
    %c0_i32 = arith.constant 0 : i32
    %c0_i32_0 = arith.constant 0 : i32
    %c0_i32_1 = arith.constant 0 : i32
    return %c0_i32, %c0_i32_0 : i32, i32
  }
  func.func @transform_2(%arg0: i32, %arg1: i32) -> (i32, i32) {
    %c0_i32 = arith.constant 0 : i32
    %c0_i32_0 = arith.constant 0 : i32
    %c0_i32_1 = arith.constant 0 : i32
    return %c0_i32, %c0_i32_0 : i32, i32
  }
  func.func @transform_3(%arg0: i32, %arg1: i32) -> (i32, i32) {
    %c0_i32 = arith.constant 0 : i32
    %c0_i32_0 = arith.constant 0 : i32
    return %arg1, %c0_i32 : i32, i32
  }
  func.func @transform_4(%arg0: i32, %arg1: i32) -> (i32, i32) {
    %c0_i32 = arith.constant 0 : i32
    %c0_i32_0 = arith.constant 0 : i32
    %c0_i32_1 = arith.constant 0 : i32
    return %c0_i32, %c0_i32_0 : i32, i32
  }
  func.func @transform_5(%arg0: i32, %arg1: i32) -> (i32, i32) {
    %c0_i32 = arith.constant 0 : i32
    %c0_i32_0 = arith.constant 0 : i32
    return %arg0, %c0_i32 : i32, i32
  }
}

</mosaic_0001>

<bundles_post_ra>
// kernel: tpu_custom_call.1
= control target key start
LH: loop header
LB: loop body
LE: loop exit
PB: predicated region body
PF: predicated region fallthrough
CT: control target
= control target key end

     0   :  { %11 = vsyncpa [#allocation5], 0  ;;  %s451_s0 = inlined_call_operand.hbm [shape: f32[8,8,200], index: 0, kind: input, shape index: {}]   ;;  %s452_s1 = inlined_call_operand.vmem [shape: f32[1,200], index: 1, kind: input, shape index: {}]   ;;  %s453_s2 = inlined_call_operand.<no memory space> [shape: f32[1,1], index: 2, kind: input, shape index: {}]   ;;  %s454_s3 = inlined_call_operand.vmem [shape: f32[8,128], index: 3, kind: input, shape index: {}]   ;;  %s455_s4 = inlined_call_operand.vmem [shape: f32[1,128], index: 4, kind: input, shape index: {}]   ;;  %s456_s5 = inlined_call_operand.hbm [shape: f32[8,128], index: 5, kind: output, shape index: {}]  }
   0x1   :  { %12 = vsyncpa [#allocation6], 0  ;;  %s361_s18 = smov [#allocation4]   ;;  %s313_s22 = scalar_lea.hbm %s451_s0, 2048 }
   0x2   :  { %s18_s19 = sshll.u32 %s361_s18, 4  ;;  %p314_p0 = scmp.ne.s32.totalorder %s451_s0, %s313_s22  ;;  %s19_s19 = int_to_ptr.vmem [resolvable:$true] %s18_s19 }
   0x3   :  { %p317_p1 = scmp.lt.u32.totalorder %s313_s22, %s451_s0 }
   0x5   :  { %p319_p2 = pnand %p317_p1, %p314_p0 }
   0x7   :  { %322 = shalt.err (!%p319_p2)
}
   0x8   :  { %s323_s27 = scalar_lea.vmem %s19_s19, 2048  ;;  %p328_p4 = scmp.lt.s32.totalorder %s19_s19, %s19_s19 }
   0x9   :  { %p324_p3 = scmp.ne.s32.totalorder %s19_s19, %s323_s27  ;;  %p329_p5 = scmp.lt.s32.totalorder %s323_s27, %s323_s27 }
   0xb   :  { %p330_p6 = por %p329_p5, %p328_p4 }
   0xd   :  { %p331_p7 = pnand %p330_p6, %p324_p3 }
   0xf   :  { %334 = shalt.err (!%p331_p7)
}
  0x10   :  { %s362_s28 = smov 256   ;;  %s363_s29 = smov 16  }
  0x11   :  { %24 = dma.hbm_to_vmem [thread:$0]  %s451_s0, 2048, %s19_s19, [#allocation5], %s362_s28, %s362_s28, %s363_s29  }
  0x12   :  { %357 = dma.done.wait [#allocation5], 2048  }
  0x13   :  { %358 = vsyncadd [#allocation5], 4294965248  ;;  %v60_v0 = vlaneseq  ;;  %v41_v6 = vld [vmem:[#allocation4] sm:$0xff]  ;;  %v42_v7 = vld [vmem:[#allocation4 + $0x8] sm:$0xff]  ;;  %vm86_vm0 = vcmask 588800   ;;  %v364_v58 = vmov 0.0   ;;  %v119_v59 = vstv %s453_s2 }
  0x14   :  { %v57_v8 = vld [vmem:[%s452_s1] sm:$0x3]  ;;  %v46_v12 = vld [vmem:[#allocation4 + $0x28] sm:$0xff]  ;;  %v43_v13 = vld [vmem:[#allocation4 + $0x10] sm:$0xff]  ;;  %302 = vmatprep.subr.mxu0 %v364_v58  ;;  %vm365_vm1 = vmmov 0   ;;  %vm180_vm2 = vcmask 1041409  }
  0x15   :  { %v61_v1 = vshrl.u32 %v60_v0, 7  ;;  %v147_v2 = vand.u32 127, %v60_v0  ;;  %v45_v11 = vld [vmem:[#allocation4 + $0x20] sm:$0xff]  ;;  %v44_v14 = vld [vmem:[#allocation4 + $0x18] sm:$0xff]  ;;  %v47_v15 = vld [vmem:[#allocation4 + $0x30] sm:$0xff]  ;;  %304 = vmatprep.mubr.msk.f32.mxu0 %vm365_vm1, %v364_v58  ;;  %vm182_vm3 = vcmask 1042434  }
  0x16   :  { %v48_v16 = vld [vmem:[#allocation4 + $0x38] sm:$0xff]  ;;  %v50_v21 = vld [vmem:[#allocation4 + $0x48] sm:$0xff]  ;;  %v49_v26 = vld [vmem:[#allocation4 + $0x40] sm:$0xff]  ;;  %vm184_vm4 = vcmask 1043459   ;;  %vm186_vm5 = vcmask 1044484   ;;  %vm188_vm6 = vcmask 1045509  }
  0x17   :  { %v62_v3 = vsub.s32 0, %v61_v1  ;;  %v66_v4 = vsub.s32 1, %v61_v1  ;;  %v409_v5 = vsub.s32 %v147_v2, %v61_v1  ;;  %v51_v30 = vld [vmem:[#allocation4 + $0x50] sm:$0xff]  ;;  %v52_v31 = vld [vmem:[#allocation4 + $0x58] sm:$0xff]  ;;  %v54_v36 = vld [vmem:[#allocation4 + $0x68] sm:$0xff]  ;;  %vm190_vm7 = vcmask 1046534  }
  0x18   :  { %v56_v37 = vld [vmem:[#allocation4 + $0x78] sm:$0xff]  ;;  %v53_v44 = vld [vmem:[#allocation4 + $0x60] sm:$0xff]  ;;  %v55_v46 = vld [vmem:[#allocation4 + $0x70] sm:$0xff]  ;;  %vm192_vm8 = vcmask 1047559   ;;  %vm194_vm9 = vcmask 64512   ;;  %s366_s11 = smov [#allocation7]  }
  0x19   :  { %v63_v9 = vrot.slane %v57_v8, %v62_v3  ;;  %v67_v10 = vrot.slane %v57_v8, %v66_v4  ;;  %v137_v57 = vld [vmem:[%s454_s3] sm:$0xff]  ;;  %s289_s12 = sshll.u32 %s366_s11, 4  ;;  %s290_s12 = int_to_ptr.vmem [resolvable:$true] %s289_s12 }
  0x1a   :  { %303 = vmatpush3.msra.mxu0 %v137_v57  ;;  %s335_s13 = scalar_lea.vmem %s290_s12, 128  ;;  %p340_p9 = scmp.lt.s32.totalorder %s290_s12, %s290_s12 }
  0x1b   :  { %v70_v17 = vmul.f32 %v63_v9, %v41_v6  ;;  %v71_v18 = vmul.f32 %v67_v10, %v42_v7  ;;  %v74_v19 = vmul.f32 %v63_v9, %v45_v11  ;;  %v75_v20 = vmul.f32 %v67_v10, %v46_v12  ;;  %p336_p8 = scmp.ne.s32.totalorder %s290_s12, %s335_s13  ;;  %p341_p10 = scmp.lt.s32.totalorder %s335_s13, %s335_s13 }
  0x1c   :  { %v72_v22 = vmul.f32 %v63_v9, %v43_v13  ;;  %v73_v23 = vmul.f32 %v67_v10, %v44_v14  ;;  %v76_v24 = vmul.f32 %v63_v9, %v47_v15  ;;  %v77_v25 = vmul.f32 %v67_v10, %v48_v16 }
  0x1d   :  { %v87_v27 = vsel %vm86_vm0, %v71_v18, 0.0  ;;  %v95_v28 = vsel %vm86_vm0, %v75_v20, 0.0  ;;  %v79_v29 = vmul.f32 %v67_v10, %v50_v21  ;;  %v78_v39 = vmul.f32 %v63_v9, %v49_v26  ;;  %p342_p11 = por %p341_p10, %p340_p9 }
  0x1e   :  { %v88_v32 = vadd.f32 %v87_v27, %v70_v17  ;;  %v96_v33 = vadd.f32 %v95_v28, %v74_v19  ;;  %v91_v34 = vsel %vm86_vm0, %v73_v23, 0.0  ;;  %v99_v35 = vsel %vm86_vm0, %v77_v25, 0.0 }
  0x1f   :  { %v92_v38 = vadd.f32 %v91_v34, %v72_v22  ;;  %v100_v40 = vadd.f32 %v99_v35, %v76_v24  ;;  %v103_v41 = vsel %vm86_vm0, %v79_v29, 0.0  ;;  %v80_v42 = vmul.f32 %v63_v9, %v51_v30  ;;  %p343_p12 = pnand %p342_p11, %p336_p8 }
  0x20   :  { %89 = vadd.xlane.f32.xlu0 %v88_v32  ;;  %97 = vadd.xlane.f32.xlu1 %v96_v33  ;;  %v81_v43 = vmul.f32 %v67_v10, %v52_v31  ;;  %v83_v45 = vmul.f32 %v67_v10, %v54_v36  ;;  %v85_v47 = vmul.f32 %v67_v10, %v56_v37  ;;  %v299_v36 = vld [vmem:[%s455_s4] ss:$0 sm:$0xff] }
  0x21   :  { %v104_v49 = vadd.f32 %v103_v41, %v78_v39  ;;  %v82_v51 = vmul.f32 %v63_v9, %v53_v44  ;;  %v84_v52 = vmul.f32 %v63_v9, %v55_v46 }
  0x22   :  { %v107_v48 = vsel %vm86_vm0, %v81_v43, 0.0  ;;  %v111_v53 = vsel %vm86_vm0, %v83_v45, 0.0  ;;  %v115_v54 = vsel %vm86_vm0, %v85_v47, 0.0 }
  0x23   :  { %v108_v50 = vadd.f32 %v107_v48, %v80_v42  ;;  %v112_v55 = vadd.f32 %v111_v53, %v82_v51  ;;  %v116_v56 = vadd.f32 %v115_v54, %v84_v52 }
  0x24   :  { %93 = vadd.xlane.f32.xlu0 %v92_v38  ;;  %101 = vadd.xlane.f32.xlu1 %v100_v40 }
  0x28   :  { %105 = vadd.xlane.f32.xlu0 %v104_v49  ;;  %109 = vadd.xlane.f32.xlu1 %v108_v50 }
  0x2c   :  { %113 = vadd.xlane.f32.xlu0 %v112_v55  ;;  %117 = vadd.xlane.f32.xlu1 %v116_v56 }
  0xad   :  { %v90_v60 = vpop.xlane.xlu0 %89  ;;  %v98_v61 = vpop.xlane.xlu1 %97 }
  0xae   :  { %v120_v62 = vadd.f32 %v119_v59, %v90_v60  ;;  %v122_v63 = vadd.f32 %v119_v59, %v98_v61 }
  0xb0   :  { %v128_v0 = vmax.f32 %v120_v62, 0.0  ;;  %v130_v6 = vmax.f32 %v122_v63, 0.0 }
  0xb1   :  { %v94_v1 = vpop.xlane.xlu0 %93  ;;  %v102_v2 = vpop.xlane.xlu1 %101 }
  0xb2   :  { %v121_v3 = vadd.f32 %v119_v59, %v94_v1  ;;  %v123_v4 = vadd.f32 %v119_v59, %v102_v2  ;;  %v151_v9 = vrot.slane %v128_v0, %v409_v5  ;;  %v159_v16 = vrot.slane %v130_v6, %v409_v5 }
  0xb4   :  { %v129_v7 = vmax.f32 %v121_v3, 0.0  ;;  %v131_v8 = vmax.f32 %v123_v4, 0.0 }
  0xb5   :  { %v106_v10 = vpop.xlane.xlu0 %105  ;;  %v110_v11 = vpop.xlane.xlu1 %109 }
  0xb6   :  { %v155_v12 = vrot.slane %v129_v7, %v409_v5  ;;  %v163_v13 = vrot.slane %v131_v8, %v409_v5  ;;  %v124_v14 = vadd.f32 %v119_v59, %v106_v10  ;;  %v125_v15 = vadd.f32 %v119_v59, %v110_v11 }
  0xb8   :  { %v181_v17 = vsel %vm180_vm2, %v155_v12, %v151_v9  ;;  %v132_v18 = vmax.f32 %v124_v14, 0.0  ;;  %v133_v19 = vmax.f32 %v125_v15, 0.0 }
  0xb9   :  { %v183_v20 = vsel %vm182_vm3, %v159_v16, %v181_v17  ;;  %v114_v21 = vpop.xlane.xlu0 %113  ;;  %v118_v22 = vpop.xlane.xlu1 %117 }
  0xba   :  { %v185_v23 = vsel %vm184_vm4, %v163_v13, %v183_v20  ;;  %v167_v24 = vrot.slane %v132_v18, %v409_v5  ;;  %v126_v25 = vadd.f32 %v119_v59, %v114_v21  ;;  %v171_v26 = vrot.slane %v133_v19, %v409_v5 }
  0xbb   :  { %v127_v27 = vadd.f32 %v119_v59, %v118_v22 }
  0xbc   :  { %v187_v28 = vsel %vm186_vm5, %v167_v24, %v185_v23  ;;  %v134_v29 = vmax.f32 %v126_v25, 0.0 }
  0xbd   :  { %v135_v30 = vmax.f32 %v127_v27, 0.0  ;;  %v189_v32 = vsel %vm188_vm6, %v171_v26, %v187_v28 }
  0xbe   :  { %v175_v31 = vrot.slane %v134_v29, %v409_v5 }
  0xbf   :  { %v179_v33 = vrot.slane %v135_v30, %v409_v5 }
  0xc0   :  { %v191_v34 = vsel %vm190_vm7, %v175_v31, %v189_v32 }
  0xc1   :  { %v193_v35 = vsel %vm192_vm8, %v179_v33, %v191_v34 }
  0xc2   :  { %305 = vmatmul.mubr.msk.f32.vlgmr.msra.gmra.mrb[0].mxu0 %vm194_vm9, %v193_v35 }
 0x195   :  { %v263_v37 = vpop.f32.mrb[0].mxu0 }
 0x196   :  { %v280_v38 = vadd.f32 %v299_v36, %v263_v37  ;;  %v306_v39 = vpop.f32.mrb[1].mxu0 }
 0x198   :  { %v281_v40 = vmax.f32 %v280_v38, 0.0 }
 0x19a   :  { %282 = vst [vmem:[#allocation7] sm:$0xff] %v281_v40 }
 0x19b   :  { %346 = shalt.err (!%p343_p12)
}
 0x19c   :  { %s347_s16 = scalar_lea.hbm %s456_s5, 128 }
 0x19d   :  { %p348_p13 = scmp.ne.s32.totalorder %s456_s5, %s347_s16  ;;  %p351_p0 = scmp.lt.u32.totalorder %s347_s16, %s456_s5 }
 0x19f   :  { %p353_p1 = pnand %p351_p0, %p348_p13 }
 0x1a1   :  { %356 = shalt.err (!%p353_p1)
}
 0x1a2   :  { %292 = dma.vmem_to_hbm [thread:$0]  %s290_s12, 128, %s456_s5, [#allocation6]  }
 0x1a3   :  { %359 = dma.done.wait [#allocation6], 128  }
 0x1a4   :  { %360 = vsyncadd [#allocation6], 4294967168 }
 0x1a5   :  { %296 = vsyncpa [#allocation5], 1 }
 0x1a6   :  { %297 = vsyncpa [#allocation6], 1 }

</bundles_post_ra>
